<compile_context>
chip_gen: v5e
topology: v5e:2x2
jax: 0.10.0
libtpu: 0.0.40
codegen_flags: <defaults>
</compile_context>

<pallas_src>
import functools

import jax
import jax.numpy as jnp
from jax.experimental import pallas as pl
from jax.experimental.pallas import tpu as pltpu


def _write_partial(o_ref, per_sample, i, *, B, TB):
    """Reduce per-sample losses of this batch tile and store lane-dense."""
    if B % TB != 0:  # drop padded batch rows (select, not multiply -> NaN safe)
        row = jax.lax.broadcasted_iota(jnp.int32, (TB, 1), 0) + i * TB
        per_sample = jnp.where(row < B, per_sample, 0.0)
    partial = jnp.sum(per_sample)
    # lane-dense (8, 128) output tile: partial sum at [0, 0], zeros elsewhere
    r = jax.lax.broadcasted_iota(jnp.int32, (8, 128), 0)
    c = jax.lax.broadcasted_iota(jnp.int32, (8, 128), 1)
    o_ref[...] = jnp.where((r == 0) & (c == 0), partial, 0.0)


def _ce_kernel(x_ref, lab_ref, o_ref, *scratch, B, C, TB, TC, NC):
    i = pl.program_id(0)                               # batch-tile index ("parallel")

    x = x_ref[...].astype(jnp.float32)                 # [TB, TC]
    lab = lab_ref[...]                                 # [TB, 1] int32
    col = jax.lax.broadcasted_iota(jnp.int32, (TB, TC), 1)

    if NC == 1:
        # Fast path: whole class dim in one tile (TC == C, no class padding).
        tile_max = jnp.max(x, axis=-1, keepdims=True)                       # [TB, 1]
        lse = tile_max + jnp.log(
            jnp.sum(jnp.exp(x - tile_max), axis=-1, keepdims=True))
        target = jnp.sum(jnp.where(col == lab, x, 0.0), axis=-1, keepdims=True)
        _write_partial(o_ref, lse - target, i, B=B, TB=TB)
        return

    # --- multi class-tile path: online logsumexp across the "arbitrary" axis ---
    j = pl.program_id(1)                               # class-tile index (reduction)
    nj = pl.num_programs(1)
    m_sc, l_sc, t_sc = scratch

    @pl.when(j == 0)
    def _init():
        m_sc[...] = jnp.full_like(m_sc, -1e30)
        l_sc[...] = jnp.zeros_like(l_sc)
        t_sc[...] = jnp.zeros_like(t_sc)

    gcol = col + j * TC                                # global class index per lane
    # mask padded class lanes (only emitted when TC does not divide C)
    xm = jnp.where(gcol < C, x, -1e30) if C % TC != 0 else x

    # online logsumexp update across class tiles
    tile_max = jnp.max(xm, axis=-1, keepdims=True)     # [TB, 1]
    m_new = jnp.maximum(m_sc[...], tile_max)
    l_sc[...] = (l_sc[...] * jnp.exp(m_sc[...] - m_new)
                 + jnp.sum(jnp.exp(xm - m_new), axis=-1, keepdims=True))
    m_sc[...] = m_new

    # target logit (label falls into exactly one class tile); select, not one-hot mul
    t_sc[...] = t_sc[...] + jnp.sum(jnp.where(gcol == lab, x, 0.0),
                                    axis=-1, keepdims=True)

    @pl.when(j == nj - 1)
    def _finalize():
        per_sample = m_sc[...] + jnp.log(l_sc[...]) - t_sc[...]             # [TB, 1]
        _write_partial(o_ref, per_sample, i, B=B, TB=TB)


def classification_loss(x, gt_label, *, tb_max=512, tc_max=2048):
    """x: [B, C] float logits; gt_label: [B] integer class indices. Returns scalar f32."""
    B, C = x.shape
    # Tile sizes: use the full dim when small (always a legal block), otherwise an
    # (8,128)-aligned cap.  512x2048 f32 = 4 MiB per input tile, ~8 MiB double-buffered:
    # safe on v5e/v6e (128 MiB VMEM) and v7x (64 MiB), no vmem_limit override needed.
    TB = B if B <= tb_max else tb_max          # tb_max must be a multiple of 8
    TC = C if C <= tc_max else tc_max          # tc_max must be a multiple of 128
    NB = pl.cdiv(B, TB)
    NC = pl.cdiv(C, TC)

    lab2d = gt_label.astype(jnp.int32).reshape(B, 1)

    kernel = functools.partial(_ce_kernel, B=B, C=C, TB=TB, TC=TC, NC=NC)

    # scratch only needed when the class axis is actually reduced across tiles
    scratch = [] if NC == 1 else [pltpu.VMEM((TB, 1), jnp.float32) for _ in range(3)]

    cost = pl.CostEstimate(
        flops=5 * B * C,
        transcendentals=B * C,
        bytes_accessed=int(x.size) * x.dtype.itemsize + B * 4 + NB * 8 * 128 * 4,
    )

    partials = pl.pallas_call(
        kernel,
        out_shape=jax.ShapeDtypeStruct((NB * 8, 128), jnp.float32),
        grid=(NB, NC),
        in_specs=[
            pl.BlockSpec((TB, TC), lambda i, j: (i, j)),   # logits tile
            pl.BlockSpec((TB, 1), lambda i, j: (i, 0)),    # labels, resident per batch tile
        ],
        out_specs=pl.BlockSpec((8, 128), lambda i, j: (i, 0)),
        scratch_shapes=scratch,
        compiler_params=pltpu.CompilerParams(
            dimension_semantics=("parallel", "arbitrary")),
        cost_estimate=cost,
    )(x, lab2d)

    # TODO(synk): PyTorch's default ignore_index=-100 is not handled (labels assumed valid).
    return jnp.sum(partials) / jnp.float32(B)


if __name__ == "__main__":
    key = jax.random.PRNGKey(0)
    kx, kl = jax.random.split(key)

    # small shapes consistent with the module: x [B, num_classes], labels [B]
    B, C = 8, 32
    x = jax.random.normal(kx, (B, C), dtype=jnp.float32)
    gt_label = jax.random.randint(kl, (B,), 0, C, dtype=jnp.int32)

    loss = classification_loss(x, gt_label)
    jax.block_until_ready(loss)

    # reference check (same math as nn.CrossEntropyLoss, reduction='mean')
    logp = jax.nn.log_softmax(x, axis=-1)
    ref = -jnp.mean(logp[jnp.arange(B), gt_label])
    assert jnp.allclose(loss, ref, atol=1e-5, rtol=1e-5), (loss, ref)

    # second check exercising the tiled / padded multi-class-tile path (grid > 1 on both axes)
    B2, C2 = 10, 200
    k2x, k2l = jax.random.split(jax.random.PRNGKey(1))
    x2 = jax.random.normal(k2x, (B2, C2), dtype=jnp.float32)
    l2 = jax.random.randint(k2l, (B2,), 0, C2, dtype=jnp.int32)
    loss2 = classification_loss(x2, l2, tb_max=8, tc_max=128)
    jax.block_until_ready(loss2)
    logp2 = jax.nn.log_softmax(x2, axis=-1)
    ref2 = -jnp.mean(logp2[jnp.arange(B2), l2])
    assert jnp.allclose(loss2, ref2, atol=1e-4, rtol=1e-4), (loss2, ref2)

    print("KERNEL_OK")
</pallas_src>

<mosaic_0001>
module attributes {stable_mosaic.version = 11 : i64} {
  func.func @_ce_kernel(%arg0: i32, %arg1: i32, %arg2: memref<8x32xf32, #tpu.memory_space<vmem>>, %arg3: memref<8x1xi32, #tpu.memory_space<vmem>>, %arg4: memref<8x128xf32, #tpu.memory_space<vmem>>) attributes {dimension_semantics = [#tpu.dimension_semantics<parallel>, #tpu.dimension_semantics<arbitrary>], iteration_bounds = array<i64: 1, 1>, scalar_prefetch = 0 : i64, scratch_operands = 0 : i64, tpu.core_type = #tpu.core_type<tc>, window_params = [{transform_indices = @transform_0, window_bounds = array<i64: 8, 32>}, {transform_indices = @transform_1, window_bounds = array<i64: 8, 1>}, {transform_indices = @transform_2, window_bounds = array<i64: 8, 128>}]} {
    %c0 = arith.constant 0 : index
    %c0_0 = arith.constant 0 : index
    %0 = vector.load %arg2[%c0, %c0_0] : memref<8x32xf32, #tpu.memory_space<vmem>>, vector<8x32xf32>
    %c0_1 = arith.constant 0 : index
    %c0_2 = arith.constant 0 : index
    %1 = vector.load %arg3[%c0_1, %c0_2] : memref<8x1xi32, #tpu.memory_space<vmem>>, vector<8x1xi32>
    %2 = tpu.iota {dimensions = array<i32: 1>} : vector<8x32xi32>
    %cst = arith.constant dense<0xFF800000> : vector<8xf32>
    %3 = vector.multi_reduction <maximumf>, %0, %cst [1] : vector<8x32xf32> to vector<8xf32>
    %4 = vector.shape_cast %3 : vector<8xf32> to vector<8x1xf32>
    %5 = vector.broadcast %4 : vector<8x1xf32> to vector<8x32xf32>
    %6 = arith.subf %0, %5 : vector<8x32xf32>
    %7 = math.exp %6 : vector<8x32xf32>
    %cst_3 = arith.constant dense<0.000000e+00> : vector<8xf32>
    %8 = vector.multi_reduction <add>, %7, %cst_3 [1] : vector<8x32xf32> to vector<8xf32>
    %9 = vector.shape_cast %8 : vector<8xf32> to vector<8x1xf32>
    %10 = math.log %9 : vector<8x1xf32>
    %11 = arith.addf %4, %10 : vector<8x1xf32>
    %12 = vector.broadcast %1 : vector<8x1xi32> to vector<8x32xi32>
    %13 = arith.cmpi eq, %2, %12 : vector<8x32xi32>
    %cst_4 = arith.constant 0.000000e+00 : f32
    %14 = vector.broadcast %cst_4 : f32 to vector<8x32xf32>
    %15 = arith.select %13, %0, %14 : vector<8x32xi1>, vector<8x32xf32>
    %cst_5 = arith.constant dense<0.000000e+00> : vector<8xf32>
    %16 = vector.multi_reduction <add>, %15, %cst_5 [1] : vector<8x32xf32> to vector<8xf32>
    %17 = vector.shape_cast %16 : vector<8xf32> to vector<8x1xf32>
    %18 = arith.subf %11, %17 : vector<8x1xf32>
    %19 = vector.shape_cast %18 : vector<8x1xf32> to vector<1x8x1xf32>
    %cst_6 = arith.constant dense<0.000000e+00> : vector<1xf32>
    %20 = vector.multi_reduction <add>, %19, %cst_6 [1, 2] : vector<1x8x1xf32> to vector<1xf32>
    %21 = vector.shape_cast %20 : vector<1xf32> to vector<1x1x1xf32>
    %22 = vector.extract %21[0, 0, 0] : f32 from vector<1x1x1xf32>
    %23 = tpu.iota {dimensions = array<i32: 0>} : vector<8x128xi32>
    %24 = tpu.iota {dimensions = array<i32: 1>} : vector<8x128xi32>
    %c0_i32 = arith.constant 0 : i32
    %25 = vector.broadcast %c0_i32 : i32 to vector<8x128xi32>
    %26 = arith.cmpi eq, %23, %25 : vector<8x128xi32>
    %c0_i32_7 = arith.constant 0 : i32
    %27 = vector.broadcast %c0_i32_7 : i32 to vector<8x128xi32>
    %28 = arith.cmpi eq, %24, %27 : vector<8x128xi32>
    %29 = arith.andi %26, %28 : vector<8x128xi1>
    %cst_8 = arith.constant 0.000000e+00 : f32
    %30 = vector.broadcast %22 : f32 to vector<8x128xf32>
    %31 = vector.broadcast %cst_8 : f32 to vector<8x128xf32>
    %32 = arith.select %29, %30, %31 : vector<8x128xi1>, vector<8x128xf32>
    %c0_9 = arith.constant 0 : index
    %c0_10 = arith.constant 0 : index
    %33 = vector.load %arg4[%c0_9, %c0_10] : memref<8x128xf32, #tpu.memory_space<vmem>>, vector<8x128xf32>
    tpu.vector_store %arg4[%c0_9, %c0_10], %32 {strides = array<i32>} : memref<8x128xf32, #tpu.memory_space<vmem>>, vector<8x128xf32>,
    return
  }
  func.func @transform_0(%arg0: i32, %arg1: i32) -> (i32, i32) {
    %c0_i32 = arith.constant 0 : i32
    return %arg0, %arg1 : i32, i32
  }
  func.func @transform_1(%arg0: i32, %arg1: i32) -> (i32, i32) {
    %c0_i32 = arith.constant 0 : i32
    %c0_i32_0 = arith.constant 0 : i32
    return %arg0, %c0_i32 : i32, i32
  }
  func.func @transform_2(%arg0: i32, %arg1: i32) -> (i32, i32) {
    %c0_i32 = arith.constant 0 : i32
    %c0_i32_0 = arith.constant 0 : i32
    return %arg0, %c0_i32 : i32, i32
  }
}

</mosaic_0001>

<bundles_post_ra>
// kernel: tpu_custom_call.1
= control target key start
LH: loop header
LB: loop body
LE: loop exit
PB: predicated region body
PF: predicated region fallthrough
CT: control target
= control target key end

     0   :  { %vm16_vm0 = vcmask 261120   ;;  %s137_s0 = inlined_call_operand.vmem [shape: f32[8,32], index: 0, kind: input, shape index: {}]   ;;  %s138_s1 = inlined_call_operand.vmem [shape: s32[8,1], index: 1, kind: input, shape index: {}]   ;;  %s139_s2 = inlined_call_operand.hbm [shape: f32[8,128], index: 2, kind: output, shape index: {}]  }
   0x1   :  { %v12_v0 = vld [vmem:[%s137_s0] sm:$0xff] }
   0x2   :  { %7 = vsyncpa [#allocation3], 0  ;;  %v17_v1 = vsel %vm16_vm0, %v12_v0, -inf  ;;  %v108_v2 = vmov 0   ;;  %v13_v3 = vld [vmem:[%s138_s1] sm:$0xff]  ;;  %v14_v9 = vlaneseq  ;;  %vm38_vm2 = vcmask 7168  }
   0x3   :  { %77 = vset.pattern.permute.xlu0 %v108_v2  ;;  %s109_s0 = smov [#allocation2]   ;;  %s64_s15 = sshll.u32 %s139_s2, 4  ;;  %s65_s15 = int_to_ptr.hbm [resolvable:$true] %s64_s15 }
   0x4   :  { %18 = vmax.xlane.f32.xlu0 %v17_v1  ;;  %v15_v10 = vand.u32 127, %v14_v9  ;;  %v50_v28 = vshrl.u32 %v14_v9, 7  ;;  %s62_s1 = sshll.u32 %s109_s0, 4  ;;  %s63_s1 = int_to_ptr.vmem [resolvable:$true] %s62_s1 }
   0x6   :  { %vm51_vm3 = vcmp.eq.s32.totalorder %v50_v28, 0  ;;  %vm52_vm4 = vcmp.eq.s32.totalorder %v15_v10, 0 }
   0x7   :  { %vm53_vm5 = vmand %vm51_vm3, %vm52_vm4 }
  0x18   :  { %30 = vperm.xlu0 %77, %v13_v3  }
  0x77   :  { %v19_v4 = vpop.xlane.xlu0 %18 }
  0x78   :  { %v20_v5 = vsub.f32 %v12_v0, %v19_v4 }
  0x7a   :  { %v21_v6 = vmul.f32 1.442695, %v20_v5 }
  0x7c   :  { %78 = vpow2.f32 %v21_v6 }
  0x82   :  { %v79_v7 = vpop.eup %78 }
  0x83   :  { %v23_v8 = vsel %vm16_vm0, %v79_v7, 0.0 }
  0x84   :  { %24 = vadd.xlane.f32.xlu1 %v23_v8 }
  0x8a   :  { %v31_v11 = vpop.permute.xlu0 %30 }
  0x8b   :  { %vm32_vm1 = vcmp.eq.s32.totalorder %v15_v10, %v31_v11 }
  0x8c   :  { %v33_v12 = vsel %vm32_vm1, %v12_v0, 0.0 }
  0x8d   :  { %v34_v13 = vsel %vm16_vm0, %v33_v12, 0.0 }
  0x8e   :  { %35 = vadd.xlane.f32.xlu1 %v34_v13 }
  0xf7   :  { %v25_v14 = vpop.xlane.xlu1 %24 }
  0xf8   :  { %80 = vlog2.f32 %v25_v14 }
  0xfe   :  { %v81_v15 = vpop.eup %80 }
  0xff   :  { %v27_v16 = vmul.f32 0.6931472, %v81_v15 }
 0x101   :  { %v28_v17 = vadd.f32 %v27_v16, %v19_v4  ;;  %v36_v18 = vpop.xlane.xlu1 %35 }
 0x103   :  { %v37_v19 = vsub.f32 %v28_v17, %v36_v18 }
 0x105   :  { %v39_v20 = vsel %vm38_vm2, %v37_v19, 0.0 }
 0x106   :  { %40 = vadd.xlane.f32.xlu2 %v39_v20 }
 0x179   :  { %v41_v21 = vpop.xlane.xlu2 %40 }
 0x17a   :  { %v42_v22 = vrot.slane %v41_v21, 4 }
 0x17c   :  { %v43_v23 = vadd.f32 %v42_v22, %v41_v21 }
 0x17e   :  { %v44_v24 = vrot.slane %v43_v23, 2 }
 0x180   :  { %v45_v25 = vadd.f32 %v44_v24, %v43_v23 }
 0x182   :  { %v46_v26 = vrot.slane %v45_v25, 1 }
 0x184   :  { %v47_v27 = vadd.f32 %v46_v26, %v45_v25 }
 0x186   :  { %73 = vpush %v47_v27 }
 0x1b7   :  { %s74_s16 = spop %73 }
 0x1b8   :  { %v54_v29 = vstv %s74_s16 }
 0x1b9   :  { %v55_v30 = vsel %vm53_vm5, %v54_v29, 0.0 }
 0x1ba   :  { %56 = vst [vmem:[#allocation2] sm:$0xff] %v55_v30 }
 0x1bb   :  { %67 = dma.vmem_to_hbm [thread:$0]  %s63_s1, 128, %s65_s15, [#allocation3]  }
 0x1bc   :  { %106 = dma.done.wait [#allocation3], 128  }
 0x1bd   :  { %107 = vsyncadd [#allocation3], 4294967168 }
 0x1be   :  { %72 = vsyncpa [#allocation3], 1 }

</bundles_post_ra>
